<compile_context>
chip_gen: v6e
topology: v6e:2x2x1
jax: 0.10.0
libtpu: 0.0.40
codegen_flags: <defaults>
</compile_context>

<pallas_src>
import math

import jax
import jax.numpy as jnp
from jax.experimental import pallas as pl
from jax.experimental.pallas import tpu as pltpu

_LANES = 128
_SUBLANES = 8
_MAX_BLOCK_ROWS = 512  # 512*128*4B = 256 KiB per buffer per stream.


def _stitch_kernel(m_ref, x0_ref, x1_ref, x2_ref, o0_ref, o1_ref, o2_ref):
    """Fused cross-stitch mix on one (block_rows, 128) tile of each branch."""
    xs = [x0_ref[...], x1_ref[...], x2_ref[...]]
    # Literal translation of the module's sequential list-mutation loop:
    # row i of iteration j uses x[j] *after* any earlier update in the same
    # iteration, exactly like the PyTorch code.
    for j in range(3):
        xs[0] = xs[0] + m_ref[0, j] * xs[j]
        xs[1] = xs[1] + m_ref[1, j] * xs[j]
        xs[2] = xs[2] + m_ref[2, j] * xs[j]
    o0_ref[...] = xs[0]
    o1_ref[...] = xs[1]
    o2_ref[...] = xs[2]


def _round_up(x, m):
    return (x + m - 1) // m * m


@jax.jit
def stitch_unit_forward(stitch_matrix, x0, x1, x2):
    orig_shape = x0.shape
    orig_dtype = x0.dtype
    total = math.prod(orig_shape)

    rows = -(-total // _LANES)
    block_rows = min(_MAX_BLOCK_ROWS, _round_up(rows, _SUBLANES))
    rows_p = _round_up(rows, block_rows)
    pad = rows_p * _LANES - total

    def to_tiles(x):
        flat = jnp.ravel(x).astype(jnp.float32)
        if pad:
            flat = jnp.pad(flat, (0, pad))
        return flat.reshape(rows_p, _LANES)

    tile_spec = pl.BlockSpec((block_rows, _LANES), lambda i: (i, 0))
    grid = (rows_p // block_rows,)

    outs = pl.pallas_call(
        _stitch_kernel,
        grid=grid,
        in_specs=[
            pl.BlockSpec(memory_space=pltpu.MemorySpace.SMEM),  # stitch matrix
            tile_spec,
            tile_spec,
            tile_spec,
        ],
        out_specs=(tile_spec, tile_spec, tile_spec),
        out_shape=(jax.ShapeDtypeStruct((rows_p, _LANES), jnp.float32),) * 3,
        compiler_params=pltpu.CompilerParams(
            dimension_semantics=("parallel",)),
    )(stitch_matrix.astype(jnp.float32), to_tiles(x0), to_tiles(x1), to_tiles(x2))

    def from_tiles(y):
        flat = y.reshape(-1)
        if pad:
            flat = flat[:total]
        return flat.reshape(orig_shape).astype(orig_dtype)

    return tuple(from_tiles(o) for o in outs)


def stitch_unit_reference(stitch_matrix, x0, x1, x2):
    """Pure-JAX reference with identical sequential semantics."""
    xs = [x0, x1, x2]
    for j in range(3):
        xs[0] = xs[0] + stitch_matrix[0, j] * xs[j]
        xs[1] = xs[1] + stitch_matrix[1, j] * xs[j]
        xs[2] = xs[2] + stitch_matrix[2, j] * xs[j]
    return tuple(xs)


if __name__ == "__main__":
    key = jax.random.PRNGKey(0)
    k0, k1, k2 = jax.random.split(key, 3)
    shape = (2, 4, 16, 16)  # (N, C, H, W) feature maps from three task branches
    x0 = jax.random.normal(k0, shape, jnp.float32)
    x1 = jax.random.normal(k1, shape, jnp.float32)
    x2 = jax.random.normal(k2, shape, jnp.float32)

    # StitchUnit.__init__: 4x4 parameter, 0.8 on the diagonal, 0.2 elsewhere.
    stitch_matrix = jnp.full((4, 4), 0.2, jnp.float32) + 0.6 * jnp.eye(
        4, dtype=jnp.float32)

    y0, y1, y2 = stitch_unit_forward(stitch_matrix, x0, x1, x2)
    jax.block_until_ready((y0, y1, y2))

    r0, r1, r2 = stitch_unit_reference(stitch_matrix, x0, x1, x2)
    assert y0.shape == shape and y0.dtype == jnp.float32
    assert jnp.allclose(y0, r0, rtol=1e-5, atol=1e-5)
    assert jnp.allclose(y1, r1, rtol=1e-5, atol=1e-5)
    assert jnp.allclose(y2, r2, rtol=1e-5, atol=1e-5)
    print("KERNEL_OK")
</pallas_src>

<mosaic_0001>
module attributes {stable_mosaic.version = 11 : i64} {
  func.func @_stitch_kernel(%arg0: i32, %arg1: memref<4x4xf32, #tpu.memory_space<smem>>, %arg2: memref<16x128xf32, #tpu.memory_space<vmem>>, %arg3: memref<16x128xf32, #tpu.memory_space<vmem>>, %arg4: memref<16x128xf32, #tpu.memory_space<vmem>>, %arg5: memref<16x128xf32, #tpu.memory_space<vmem>>, %arg6: memref<16x128xf32, #tpu.memory_space<vmem>>, %arg7: memref<16x128xf32, #tpu.memory_space<vmem>>) attributes {dimension_semantics = [#tpu.dimension_semantics<parallel>], iteration_bounds = array<i64: 1>, scalar_prefetch = 0 : i64, scratch_operands = 0 : i64, tpu.core_type = #tpu.core_type<tc>, window_params = [{transform_indices = @transform_0, window_bounds = array<i64: 4, 4>}, {transform_indices = @transform_1, window_bounds = array<i64: 16, 128>}, {transform_indices = @transform_2, window_bounds = array<i64: 16, 128>}, {transform_indices = @transform_3, window_bounds = array<i64: 16, 128>}, {transform_indices = @transform_4, window_bounds = array<i64: 16, 128>}, {transform_indices = @transform_5, window_bounds = array<i64: 16, 128>}, {transform_indices = @transform_6, window_bounds = array<i64: 16, 128>}]} {
    %c0 = arith.constant 0 : index
    %c0_0 = arith.constant 0 : index
    %0 = vector.load %arg2[%c0, %c0_0] : memref<16x128xf32, #tpu.memory_space<vmem>>, vector<16x128xf32>
    %c0_1 = arith.constant 0 : index
    %c0_2 = arith.constant 0 : index
    %1 = vector.load %arg3[%c0_1, %c0_2] : memref<16x128xf32, #tpu.memory_space<vmem>>, vector<16x128xf32>
    %c0_3 = arith.constant 0 : index
    %c0_4 = arith.constant 0 : index
    %2 = vector.load %arg4[%c0_3, %c0_4] : memref<16x128xf32, #tpu.memory_space<vmem>>, vector<16x128xf32>
    %c0_5 = arith.constant 0 : index
    %c0_6 = arith.constant 0 : index
    %3 = memref.load %arg1[%c0_5, %c0_6] : memref<4x4xf32, #tpu.memory_space<smem>>
    %4 = vector.broadcast %3 : f32 to vector<16x128xf32>
    %5 = arith.mulf %4, %0 : vector<16x128xf32>
    %6 = arith.addf %0, %5 : vector<16x128xf32>
    %c1 = arith.constant 1 : index
    %c0_7 = arith.constant 0 : index
    %7 = memref.load %arg1[%c1, %c0_7] : memref<4x4xf32, #tpu.memory_space<smem>>
    %8 = vector.broadcast %7 : f32 to vector<16x128xf32>
    %9 = arith.mulf %8, %6 : vector<16x128xf32>
    %10 = arith.addf %1, %9 : vector<16x128xf32>
    %c2 = arith.constant 2 : index
    %c0_8 = arith.constant 0 : index
    %11 = memref.load %arg1[%c2, %c0_8] : memref<4x4xf32, #tpu.memory_space<smem>>
    %12 = vector.broadcast %11 : f32 to vector<16x128xf32>
    %13 = arith.mulf %12, %6 : vector<16x128xf32>
    %14 = arith.addf %2, %13 : vector<16x128xf32>
    %c0_9 = arith.constant 0 : index
    %c1_10 = arith.constant 1 : index
    %15 = memref.load %arg1[%c0_9, %c1_10] : memref<4x4xf32, #tpu.memory_space<smem>>
    %16 = vector.broadcast %15 : f32 to vector<16x128xf32>
    %17 = arith.mulf %16, %10 : vector<16x128xf32>
    %18 = arith.addf %6, %17 : vector<16x128xf32>
    %c1_11 = arith.constant 1 : index
    %c1_12 = arith.constant 1 : index
    %19 = memref.load %arg1[%c1_11, %c1_12] : memref<4x4xf32, #tpu.memory_space<smem>>
    %20 = vector.broadcast %19 : f32 to vector<16x128xf32>
    %21 = arith.mulf %20, %10 : vector<16x128xf32>
    %22 = arith.addf %10, %21 : vector<16x128xf32>
    %c2_13 = arith.constant 2 : index
    %c1_14 = arith.constant 1 : index
    %23 = memref.load %arg1[%c2_13, %c1_14] : memref<4x4xf32, #tpu.memory_space<smem>>
    %24 = vector.broadcast %23 : f32 to vector<16x128xf32>
    %25 = arith.mulf %24, %22 : vector<16x128xf32>
    %26 = arith.addf %14, %25 : vector<16x128xf32>
    %c0_15 = arith.constant 0 : index
    %c2_16 = arith.constant 2 : index
    %27 = memref.load %arg1[%c0_15, %c2_16] : memref<4x4xf32, #tpu.memory_space<smem>>
    %28 = vector.broadcast %27 : f32 to vector<16x128xf32>
    %29 = arith.mulf %28, %26 : vector<16x128xf32>
    %30 = arith.addf %18, %29 : vector<16x128xf32>
    %c1_17 = arith.constant 1 : index
    %c2_18 = arith.constant 2 : index
    %31 = memref.load %arg1[%c1_17, %c2_18] : memref<4x4xf32, #tpu.memory_space<smem>>
    %32 = vector.broadcast %31 : f32 to vector<16x128xf32>
    %33 = arith.mulf %32, %26 : vector<16x128xf32>
    %34 = arith.addf %22, %33 : vector<16x128xf32>
    %c2_19 = arith.constant 2 : index
    %c2_20 = arith.constant 2 : index
    %35 = memref.load %arg1[%c2_19, %c2_20] : memref<4x4xf32, #tpu.memory_space<smem>>
    %36 = vector.broadcast %35 : f32 to vector<16x128xf32>
    %37 = arith.mulf %36, %26 : vector<16x128xf32>
    %38 = arith.addf %26, %37 : vector<16x128xf32>
    %c0_21 = arith.constant 0 : index
    %c0_22 = arith.constant 0 : index
    %39 = vector.load %arg5[%c0_21, %c0_22] : memref<16x128xf32, #tpu.memory_space<vmem>>, vector<16x128xf32>
    tpu.vector_store %arg5[%c0_21, %c0_22], %30 {strides = array<i32>} : memref<16x128xf32, #tpu.memory_space<vmem>>, vector<16x128xf32>,
    %c0_23 = arith.constant 0 : index
    %c0_24 = arith.constant 0 : index
    %40 = vector.load %arg6[%c0_23, %c0_24] : memref<16x128xf32, #tpu.memory_space<vmem>>, vector<16x128xf32>
    tpu.vector_store %arg6[%c0_23, %c0_24], %34 {strides = array<i32>} : memref<16x128xf32, #tpu.memory_space<vmem>>, vector<16x128xf32>,
    %c0_25 = arith.constant 0 : index
    %c0_26 = arith.constant 0 : index
    %41 = vector.load %arg7[%c0_25, %c0_26] : memref<16x128xf32, #tpu.memory_space<vmem>>, vector<16x128xf32>
    tpu.vector_store %arg7[%c0_25, %c0_26], %38 {strides = array<i32>} : memref<16x128xf32, #tpu.memory_space<vmem>>, vector<16x128xf32>,
    return
  }
  func.func @transform_0(%arg0: i32) -> (i32, i32) {
    %c0_i32 = arith.constant 0 : i32
    %c0_i32_0 = arith.constant 0 : i32
    %c0_i32_1 = arith.constant 0 : i32
    return %c0_i32, %c0_i32_0 : i32, i32
  }
  func.func @transform_1(%arg0: i32) -> (i32, i32) {
    %c0_i32 = arith.constant 0 : i32
    %c0_i32_0 = arith.constant 0 : i32
    return %arg0, %c0_i32 : i32, i32
  }
  func.func @transform_2(%arg0: i32) -> (i32, i32) {
    %c0_i32 = arith.constant 0 : i32
    %c0_i32_0 = arith.constant 0 : i32
    return %arg0, %c0_i32 : i32, i32
  }
  func.func @transform_3(%arg0: i32) -> (i32, i32) {
    %c0_i32 = arith.constant 0 : i32
    %c0_i32_0 = arith.constant 0 : i32
    return %arg0, %c0_i32 : i32, i32
  }
  func.func @transform_4(%arg0: i32) -> (i32, i32) {
    %c0_i32 = arith.constant 0 : i32
    %c0_i32_0 = arith.constant 0 : i32
    return %arg0, %c0_i32 : i32, i32
  }
  func.func @transform_5(%arg0: i32) -> (i32, i32) {
    %c0_i32 = arith.constant 0 : i32
    %c0_i32_0 = arith.constant 0 : i32
    return %arg0, %c0_i32 : i32, i32
  }
  func.func @transform_6(%arg0: i32) -> (i32, i32) {
    %c0_i32 = arith.constant 0 : i32
    %c0_i32_0 = arith.constant 0 : i32
    return %arg0, %c0_i32 : i32, i32
  }
}

</mosaic_0001>

<bundles_post_ra>
// kernel: stitch_unit_forward.1
= control target key start
LH: loop header
LB: loop body
LE: loop exit
PB: predicated region body
PF: predicated region fallthrough
CT: control target
= control target key end

     0   :  { %12 = vsyncpa [#allocation3], 0  ;;  %s216_s0 = inlined_call_operand.vmem [shape: f32[4,4], index: 0, kind: input, shape index: {}]   ;;  %s217_s1 = inlined_call_operand.vmem [shape: f32[16,128], index: 1, kind: input, shape index: {}]   ;;  %s218_s2 = inlined_call_operand.vmem [shape: f32[16,128], index: 2, kind: input, shape index: {}]   ;;  %s219_s3 = inlined_call_operand.vmem [shape: f32[16,128], index: 3, kind: input, shape index: {}]   ;;  %s220_s4 = inlined_call_operand.vmem [shape: f32[16,128], index: 4, kind: output, shape index: {0}]   ;;  %s221_s5 = inlined_call_operand.vmem [shape: f32[16,128], index: 5, kind: output, shape index: {1}]   ;;  %s222_s6 = inlined_call_operand.vmem [shape: f32[16,128], index: 6, kind: output, shape index: {2}]  }
   0x1   :  { %s19_s23 = sshll.u32 %s216_s0, 4  ;;  %s20_s23 = int_to_ptr.vmem [resolvable:$true] %s19_s23 }
   0x2   :  { %s121_s24 = scalar_lea.vmem %s20_s23, 64  ;;  %p126_p1 = scmp.lt.s32.totalorder %s20_s23, %s20_s23 }
   0x3   :  { %p122_p0 = scmp.ne.s32.totalorder %s20_s23, %s121_s24  ;;  %p127_p2 = scmp.lt.s32.totalorder %s121_s24, %s121_s24 }
   0x5   :  { %p128_p3 = por %p127_p2, %p126_p1 }
   0x7   :  { %p129_p4 = pnand %p128_p3, %p122_p0 }
   0x9   :  { %132 = shalt.err (!%p129_p4)
}
   0xa   :  { %s135_s25 = smov [#allocation2]  }
   0xb   :  { %22 = dma.vmem_to_smem %s20_s23, 64, %s135_s25, [#allocation3]  }
   0xc   :  { %133 = dma.done.wait [#allocation3], 64  }
   0xd   :  { %134 = vsyncadd [#allocation3], 4294967232 }
   0xe   :  { %32 = sfence }
   0xf   :  { %s39_s26 = sld [smem:[#allocation2]]  ;;  %v33_v0 = vld [vmem:[%s217_s1] sm:$0xff]  ;;  %v34_v1 = vld [vmem:[%s217_s1 + $0x8] sm:$0xff] }
  0x10   :  { %s112_s27 = sld [smem:[#allocation2 + $0x80]]  ;;  %v35_v9 = vld [vmem:[%s218_s2] sm:$0xff]  ;;  %v36_v10 = vld [vmem:[%s218_s2 + $0x8] sm:$0xff] }
  0x11   :  { %s113_s28 = sld [smem:[#allocation2 + $0x100]]  ;;  %v37_v16 = vld [vmem:[%s219_s3] sm:$0xff]  ;;  %v38_v18 = vld [vmem:[%s219_s3 + $0x8] sm:$0xff] }
  0x12   :  { %s115_s0 = sld [smem:[#allocation2 + $0x81]] }
  0x13   :  { %s114_s9 = sld [smem:[#allocation2 + $0x1]] }
  0x14   :  { %s116_s10 = sld [smem:[#allocation2 + $0x101]] }
  0x15   :  { %v40_v2 = vstv %s39_s26  ;;  %s183_s13 = sld [smem:[#allocation2 + $0x2]] }
  0x16   :  { %v41_v3 = vmul.f32 %v40_v2, %v33_v0  ;;  %v42_v4 = vmul.f32 %v40_v2, %v34_v1  ;;  %v46_v5 = vstv %s112_s27  ;;  %s188_s1 = sld [smem:[#allocation2 + $0x82]] }
  0x17   :  { %v52_v7 = vstv %s113_s28  ;;  %s119_s16 = sld [smem:[#allocation2 + $0x102]] }
  0x18   :  { %v43_v6 = vadd.f32 %v41_v3, %v33_v0  ;;  %v44_v8 = vadd.f32 %v42_v4, %v34_v1  ;;  %v64_v14 = vstv %s115_s0 }
  0x19   :  { %v58_v20 = vstv %s114_s9 }
  0x1a   :  { %v47_v11 = vmul.f32 %v46_v5, %v43_v6  ;;  %v48_v12 = vmul.f32 %v46_v5, %v44_v8  ;;  %v53_v13 = vmul.f32 %v52_v7, %v43_v6  ;;  %v54_v15 = vmul.f32 %v52_v7, %v44_v8 }
  0x1b   :  { %v70_v24 = vstv %s116_s10  ;;  %v76_v32 = vstv %s183_s13 }
  0x1c   :  { %v49_v17 = vadd.f32 %v47_v11, %v35_v9  ;;  %v50_v19 = vadd.f32 %v48_v12, %v36_v10  ;;  %v55_v23 = vadd.f32 %v53_v13, %v37_v16  ;;  %v56_v25 = vadd.f32 %v54_v15, %v38_v18 }
  0x1d   :  { %v82_v33 = vstv %s188_s1  ;;  %v88_v34 = vstv %s119_s16 }
  0x1e   :  { %v65_v21 = vmul.f32 %v64_v14, %v49_v17  ;;  %v66_v22 = vmul.f32 %v64_v14, %v50_v19  ;;  %v59_v26 = vmul.f32 %v58_v20, %v49_v17  ;;  %v60_v28 = vmul.f32 %v58_v20, %v50_v19 }
  0x20   :  { %v67_v27 = vadd.f32 %v65_v21, %v49_v17  ;;  %v68_v29 = vadd.f32 %v66_v22, %v50_v19  ;;  %v61_v35 = vadd.f32 %v59_v26, %v43_v6  ;;  %v62_v37 = vadd.f32 %v60_v28, %v44_v8 }
  0x22   :  { %v71_v30 = vmul.f32 %v70_v24, %v67_v27  ;;  %v72_v31 = vmul.f32 %v70_v24, %v68_v29 }
  0x24   :  { %v73_v36 = vadd.f32 %v71_v30, %v55_v23  ;;  %v74_v38 = vadd.f32 %v72_v31, %v56_v25 }
  0x26   :  { %v77_v39 = vmul.f32 %v76_v32, %v73_v36  ;;  %v78_v40 = vmul.f32 %v76_v32, %v74_v38  ;;  %v83_v41 = vmul.f32 %v82_v33, %v73_v36  ;;  %v84_v42 = vmul.f32 %v82_v33, %v74_v38 }
  0x27   :  { %v89_v43 = vmul.f32 %v88_v34, %v73_v36  ;;  %v90_v44 = vmul.f32 %v88_v34, %v74_v38 }
  0x28   :  { %v79_v45 = vadd.f32 %v77_v39, %v61_v35  ;;  %v80_v46 = vadd.f32 %v78_v40, %v62_v37  ;;  %v85_v47 = vadd.f32 %v83_v41, %v67_v27  ;;  %v86_v48 = vadd.f32 %v84_v42, %v68_v29 }
  0x29   :  { %v91_v49 = vadd.f32 %v89_v43, %v73_v36  ;;  %v92_v50 = vadd.f32 %v90_v44, %v74_v38 }
  0x2a   :  { %93 = vst [vmem:[%s220_s4] sm:$0xff] %v79_v45  ;;  %94 = vst [vmem:[%s220_s4 + $0x8] sm:$0xff] %v80_v46 }
  0x2b   :  { %95 = vst [vmem:[%s221_s5] sm:$0xff] %v85_v47  ;;  %96 = vst [vmem:[%s221_s5 + $0x8] sm:$0xff] %v86_v48 }
  0x2c   :  { %97 = vst [vmem:[%s222_s6] sm:$0xff] %v91_v49  ;;  %98 = vst [vmem:[%s222_s6 + $0x8] sm:$0xff] %v92_v50 }
  0x2d   :  { %111 = vsyncpa [#allocation3], 1 }

</bundles_post_ra>
